<compile_context>
chip_gen: v7x
topology: tpu7x:2x2x1
jax: 0.10.0
libtpu: 0.0.40
codegen_flags: <defaults>
</compile_context>

<pallas_src>
import math
import jax
import jax.numpy as jnp
from jax.experimental import pallas as pl
from jax.experimental.pallas import tpu as pltpu


def _build_pe(emb_size: int, max_len: int = 5000, dtype=jnp.float32) -> jnp.ndarray:
    """Deterministic positional-encoding table, same math as the PyTorch __init__."""
    assert emb_size % 2 == 0, "PositionalEncoding requires an even emb_size"
    position = jnp.arange(0, max_len, dtype=jnp.float32)[:, None]             # (max_len, 1)
    div_term = jnp.exp(
        jnp.arange(0, emb_size, 2, dtype=jnp.float32) * -(math.log(10000.0) / emb_size)
    )                                                                          # (emb_size//2,)
    angles = position * div_term                                               # (max_len, emb//2)
    pe = jnp.zeros((max_len, emb_size), dtype=jnp.float32)
    pe = pe.at[:, 0::2].set(jnp.sin(angles))
    pe = pe.at[:, 1::2].set(jnp.cos(angles))
    return pe.astype(dtype)                                                    # (max_len, emb_size)


def _add_pe_kernel(x_ref, pe_ref, o_ref):
    # x_ref / pe_ref / o_ref: (TS, Ef) lane-dense tiles -> pure streaming VPU add.
    o_ref[...] = x_ref[...] + pe_ref[...]


def _add_pe_bcast_kernel(x_ref, pe_ref, o_ref):
    # Tiny-problem path: whole (B, R, Ef) slab in one step, pe broadcast over batch.
    o_ref[...] = x_ref[...] + pe_ref[...][None, :, :]


def _default_tile_bytes() -> int:
    """Pick a per-buffer tile budget from the detected VMEM capacity."""
    try:
        info = pltpu.get_tpu_info()
        vmem = getattr(info, "vmem_capacity_bytes", None)
        if vmem is not None and vmem > 64 * 1024 * 1024:
            return 8 * 1024 * 1024      # v5e / v6e: 128 MiB VMEM -> larger tiles
    except Exception:
        pass
    return 4 * 1024 * 1024              # v7x (64 MiB VMEM) / unknown: conservative


def positional_encoding_forward(x: jnp.ndarray,
                                pe_table: jnp.ndarray,
                                *,
                                target_tile_bytes: int | None = None) -> jnp.ndarray:
    """x: (B, S, E); pe_table: (max_len, E). Returns x + pe_table[:S] broadcast over batch."""
    B, S, E = x.shape
    max_len, E_pe = pe_table.shape
    assert E_pe == E, "pe_table embedding size must match x"
    assert S <= max_len, "sequence length exceeds positional-encoding table"

    # Fallback only: callers should pre-build the table in the activation dtype.
    if pe_table.dtype != x.dtype:
        pe_table = pe_table.astype(x.dtype)

    forced_tiles = target_tile_bytes is not None
    if target_tile_bytes is None:
        target_tile_bytes = _default_tile_bytes()

    itemsize = jnp.dtype(x.dtype).itemsize
    sublane = {4: 8, 2: 16, 1: 32}.get(itemsize, 8)   # dtype-aware packed-sublane multiple

    # ---- lane-density folding: make the kernel's last dim a multiple of 128.
    if E % 128 == 0:
        fold = 1
    else:
        f = math.lcm(E, 128) // E
        # Folding groups `f` consecutive positions per row; valid when S % f == 0.
        fold = f if (S % f == 0) else 1   # fallback: fold=1 (masked stores, still correct)
    R = S // fold            # folded rows per batch element
    Ef = E * fold            # folded lane width (multiple of 128 when folded)

    x_f = x.reshape(B, R, Ef)

    # ---- tiny-problem fast path: single grid step over the whole slab.
    total_bytes = (B * R * Ef + R * Ef) * itemsize
    if not forced_tiles and total_bytes <= 2 * 1024 * 1024:
        pe_sl = pe_table[:S].reshape(R, Ef)
        out_f = pl.pallas_call(
            _add_pe_bcast_kernel,
            out_shape=jax.ShapeDtypeStruct((B, R, Ef), x.dtype),
            grid_spec=pltpu.PrefetchScalarGridSpec(
                num_scalar_prefetch=0,
                grid=(1,),
                in_specs=[
                    pl.BlockSpec((B, R, Ef), lambda i: (0, 0, 0)),
                    pl.BlockSpec((R, Ef), lambda i: (0, 0)),
                ],
                out_specs=pl.BlockSpec((B, R, Ef), lambda i: (0, 0, 0)),
            ),
            compiler_params=pltpu.CompilerParams(
                dimension_semantics=("arbitrary",),
            ),
        )(x_f, pe_sl)
        return out_f.reshape(B, S, E)

    # ---- row-tile size: ~target_tile_bytes per buffer, dtype-aware sublane multiple.
    ts = max(sublane, (target_tile_bytes // (Ef * itemsize)) // sublane * sublane)
    TS = R if R <= ts else ts
    num_s_tiles = pl.cdiv(R, TS)

    # ---- pe operand: index the full folded table straight from the BlockSpec
    # (no wrapper-side slice copy) whenever the (8,128) tiling rules allow it.
    if max_len % fold == 0 and TS % sublane == 0:
        pe_op = pe_table.reshape(max_len // fold, Ef)
    else:
        pe_op = pe_table[:S].reshape(R, Ef)

    # ---- VMEM budget derived from actual usage: 3 arrays x 2 pipeline buffers + slack.
    tile_bytes = TS * Ef * itemsize
    vmem_limit = 6 * tile_bytes + 8 * 1024 * 1024
    vmem_limit = max(32 * 1024 * 1024, min(96 * 1024 * 1024, vmem_limit))

    out_f = pl.pallas_call(
        _add_pe_kernel,
        out_shape=jax.ShapeDtypeStruct((B, R, Ef), x.dtype),
        grid_spec=pltpu.PrefetchScalarGridSpec(
            num_scalar_prefetch=0,
            # Batch innermost: pe block index is constant across the inner batch
            # loop -> Pallas skips re-DMAing the pe tile (pe read once total).
            grid=(num_s_tiles, B),
            in_specs=[
                # x: one (TS, Ef) row tile per (seq-tile, batch) step; batch dim squeezed.
                pl.BlockSpec((pl.Squeezed(), TS, Ef), lambda s, b: (b, s, 0)),
                # pe: same row tile, selected by the seq-tile coordinate only.
                pl.BlockSpec((TS, Ef), lambda s, b: (s, 0)),
            ],
            out_specs=pl.BlockSpec((pl.Squeezed(), TS, Ef), lambda s, b: (b, s, 0)),
        ),
        compiler_params=pltpu.CompilerParams(
            # Outer seq-tile axis parallel (v7x core sharding); inner batch axis kept
            # sequential so the pe DMA-skip across batch is preserved per core.
            dimension_semantics=("parallel", "arbitrary"),
            vmem_limit_bytes=int(vmem_limit),
        ),
    )(x_f, pe_op)

    return out_f.reshape(B, S, E)


if __name__ == "__main__":
    key = jax.random.PRNGKey(0)
    k1, k2, k3 = jax.random.split(key, 3)

    # --- Test 1: small module-like shape (tiny single-step fast path).
    B, S, E = 2, 8, 32
    max_len = 64  # forward only uses the first S rows
    x = jax.random.normal(k1, (B, S, E), dtype=jnp.float32)
    pe = _build_pe(E, max_len=max_len, dtype=jnp.float32)
    out = jax.block_until_ready(positional_encoding_forward(x, pe))
    ref = x + pe[None, :S, :]
    assert out.shape == (B, S, E)
    assert jnp.allclose(out, ref, atol=1e-6, rtol=1e-6)

    # --- Test 2: multi-tile grid path (forced small tiles): lane-density fold for
    # E=192 (lcm fold=2), batch-inner pe DMA reuse, partial last seq tile.
    B2, S2, E2 = 2, 2048, 192
    x2 = jax.random.normal(k2, (B2, S2, E2), dtype=jnp.float32)
    pe2 = _build_pe(E2, max_len=S2, dtype=jnp.float32)
    out2 = jax.block_until_ready(
        positional_encoding_forward(x2, pe2, target_tile_bytes=512 * 1024))
    ref2 = x2 + pe2[None, :S2, :]
    assert jnp.allclose(out2, ref2, atol=1e-6, rtol=1e-6)

    # --- Test 3: bf16 grid path (16-row packed-sublane tile rounding).
    B3, S3, E3 = 2, 512, 256
    x3 = jax.random.normal(k3, (B3, S3, E3), dtype=jnp.bfloat16)
    pe3 = _build_pe(E3, max_len=S3, dtype=jnp.bfloat16)
    out3 = jax.block_until_ready(
        positional_encoding_forward(x3, pe3, target_tile_bytes=128 * 1024))
    ref3 = x3 + pe3[None, :S3, :]
    assert jnp.allclose(out3.astype(jnp.float32), ref3.astype(jnp.float32),
                        atol=1e-2, rtol=1e-2)

    print("KERNEL_OK")
</pallas_src>

<mosaic_0001>
module attributes {stable_mosaic.version = 11 : i64} {
  func.func @_add_pe_bcast_kernel(%arg0: i32, %arg1: memref<2x2x128xf32, #tpu.memory_space<vmem>>, %arg2: memref<2x128xf32, #tpu.memory_space<vmem>>, %arg3: memref<2x2x128xf32, #tpu.memory_space<vmem>>) attributes {dimension_semantics = [#tpu.dimension_semantics<arbitrary>], iteration_bounds = array<i64: 1>, scalar_prefetch = 0 : i64, scratch_operands = 0 : i64, tpu.core_type = #tpu.core_type<tc>, window_params = [{pipeline_mode = #tpu.pipeline_mode<synchronous>, transform_indices = @transform_0, window_bounds = array<i64: 2, 2, 128>}, {pipeline_mode = #tpu.pipeline_mode<synchronous>, transform_indices = @transform_1, window_bounds = array<i64: 2, 128>}, {pipeline_mode = #tpu.pipeline_mode<synchronous>, transform_indices = @transform_2, window_bounds = array<i64: 2, 2, 128>}]} {
    %c0 = arith.constant 0 : index
    %c0_0 = arith.constant 0 : index
    %c0_1 = arith.constant 0 : index
    %0 = vector.load %arg1[%c0, %c0_0, %c0_1] : memref<2x2x128xf32, #tpu.memory_space<vmem>>, vector<2x2x128xf32>
    %c0_2 = arith.constant 0 : index
    %c0_3 = arith.constant 0 : index
    %1 = vector.load %arg2[%c0_2, %c0_3] : memref<2x128xf32, #tpu.memory_space<vmem>>, vector<2x128xf32>
    %2 = vector.shape_cast %1 : vector<2x128xf32> to vector<1x2x128xf32>
    %3 = vector.broadcast %2 : vector<1x2x128xf32> to vector<2x2x128xf32>
    %4 = arith.addf %0, %3 : vector<2x2x128xf32>
    %c0_4 = arith.constant 0 : index
    %c0_5 = arith.constant 0 : index
    %c0_6 = arith.constant 0 : index
    %5 = vector.load %arg3[%c0_4, %c0_5, %c0_6] : memref<2x2x128xf32, #tpu.memory_space<vmem>>, vector<2x2x128xf32>
    tpu.vector_store %arg3[%c0_4, %c0_5, %c0_6], %4 {strides = array<i32>} : memref<2x2x128xf32, #tpu.memory_space<vmem>>, vector<2x2x128xf32>,
    return
  }
  func.func @transform_0(%arg0: i32) -> (i32, i32, i32) {
    %c0_i32 = arith.constant 0 : i32
    %c0_i32_0 = arith.constant 0 : i32
    %c0_i32_1 = arith.constant 0 : i32
    %c0_i32_2 = arith.constant 0 : i32
    return %c0_i32, %c0_i32_0, %c0_i32_1 : i32, i32, i32
  }
  func.func @transform_1(%arg0: i32) -> (i32, i32) {
    %c0_i32 = arith.constant 0 : i32
    %c0_i32_0 = arith.constant 0 : i32
    %c0_i32_1 = arith.constant 0 : i32
    return %c0_i32, %c0_i32_0 : i32, i32
  }
  func.func @transform_2(%arg0: i32) -> (i32, i32, i32) {
    %c0_i32 = arith.constant 0 : i32
    %c0_i32_0 = arith.constant 0 : i32
    %c0_i32_1 = arith.constant 0 : i32
    %c0_i32_2 = arith.constant 0 : i32
    return %c0_i32, %c0_i32_0, %c0_i32_1 : i32, i32, i32
  }
}

</mosaic_0001>

<bundles_post_ra>
// kernel: tpu_custom_call.1
= control target key start
LH: loop header
LB: loop body
LE: loop exit
PB: predicated region body
PF: predicated region fallthrough
CT: control target
= control target key end

     0   :  { %7 = vsyncpa [#allocation3], 0  ;;  %s154_s0 = inlined_call_operand.hbm [shape: f32[2,2,128], index: 0, kind: input, shape index: {}]   ;;  %s155_s1 = inlined_call_operand.vmem [shape: f32[2,128], index: 1, kind: input, shape index: {}]   ;;  %s156_s2 = inlined_call_operand.hbm [shape: f32[2,2,128], index: 2, kind: output, shape index: {}]  }
   0x1   :  { %8 = vsyncpa [#allocation4], 0  ;;  %s102_s9 = smov [#allocation2]   ;;  %s54_s13 = scalar_lea.hbm %s154_s0, 64 }
   0x2   :  { %s14_s10 = sshll.u32 %s102_s9, 4  ;;  %p55_p0 = scmp.ne.s32.totalorder %s154_s0, %s54_s13  ;;  %s15_s10 = int_to_ptr.vmem [resolvable:$true] %s14_s10 }
   0x3   :  { %p58_p1 = scmp.lt.u32.totalorder %s54_s13, %s154_s0 }
   0x5   :  { %p60_p2 = pnand %p58_p1, %p55_p0 }
   0x7   :  { %63 = shalt.err (!%p60_p2)
}
   0x8   :  { %s64_s18 = scalar_lea.vmem %s15_s10, 64  ;;  %p69_p4 = scmp.lt.s32.totalorder %s15_s10, %s15_s10 }
   0x9   :  { %p65_p3 = scmp.ne.s32.totalorder %s15_s10, %s64_s18  ;;  %p70_p5 = scmp.lt.s32.totalorder %s64_s18, %s64_s18 }
   0xb   :  { %p71_p6 = por %p70_p5, %p69_p4 }
   0xd   :  { %p72_p7 = pnand %p71_p6, %p65_p3 }
   0xf   :  { %75 = shalt.err (!%p72_p7)
}
  0x10   :  { %s103_s19 = smov 32   ;;  %s104_s20 = smov 2  }
  0x11   :  { %20 = dma.hbm_to_vmem [thread:$0]  %s154_s0, 64, %s15_s10, [#allocation3], %s103_s19, %s103_s19, %s104_s20  }
  0x12   :  { %98 = dma.done.wait [#allocation3], 64  }
  0x13   :  { %99 = vsyncadd [#allocation3], 4294967232  ;;  %s105_s23 = smov [#allocation5]   ;;  %v26_v0 = vld [vmem:[#allocation2] sm:$0x3] }
  0x14   :  { %s38_s24 = sshll.u32 %s105_s23, 4  ;;  %v28_v1 = vld [vmem:[%s155_s1] sm:$0x3]  ;;  %v27_v2 = vld [vmem:[#allocation2 + $0x2] sm:$0x3]  ;;  %s39_s24 = int_to_ptr.vmem [resolvable:$true] %s38_s24 }
  0x15   :  { %v29_v3 = vadd.f32 %v28_v1, %v26_v0  ;;  %v30_v4 = vadd.f32 %v28_v1, %v27_v2  ;;  %s76_s27 = scalar_lea.vmem %s39_s24, 64  ;;  %p81_p9 = scmp.lt.s32.totalorder %s39_s24, %s39_s24 }
  0x16   :  { %p77_p8 = scmp.ne.s32.totalorder %s39_s24, %s76_s27  ;;  %p82_p10 = scmp.lt.s32.totalorder %s76_s27, %s76_s27 }
  0x17   :  { %31 = vst [vmem:[#allocation5] sm:$0x3] %v29_v3  ;;  %32 = vst [vmem:[#allocation5 + $0x2] sm:$0x3] %v30_v4 }
  0x18   :  { %p83_p11 = por %p82_p10, %p81_p9 }
  0x1a   :  { %p84_p12 = pnand %p83_p11, %p77_p8 }
  0x1c   :  { %87 = shalt.err (!%p84_p12)
}
  0x1d   :  { %s88_s29 = scalar_lea.hbm %s156_s2, 64 }
  0x1e   :  { %p89_p13 = scmp.ne.s32.totalorder %s156_s2, %s88_s29  ;;  %p92_p0 = scmp.lt.u32.totalorder %s88_s29, %s156_s2 }
  0x20   :  { %p94_p1 = pnand %p92_p0, %p89_p13 }
  0x22   :  { %97 = shalt.err (!%p94_p1)
}
  0x23   :  { %44 = dma.vmem_to_hbm [thread:$0]  %s39_s24, 64, %s156_s2, [#allocation4], %s103_s19, %s103_s19, %s104_s20  }
  0x24   :  { %100 = dma.done.wait [#allocation4], 64  }
  0x25   :  { %101 = vsyncadd [#allocation4], 4294967232 }
  0x26   :  { %48 = vsyncpa [#allocation3], 1 }
  0x27   :  { %49 = vsyncpa [#allocation4], 1 }

</bundles_post_ra>
